<compile_context>
chip_gen: v7x
topology: tpu7x:2x2x1
jax: 0.10.0
libtpu: 0.0.40
codegen_flags: <defaults>
</compile_context>

<pallas_src>
import functools
from math import comb

import jax
import jax.numpy as jnp
from jax.experimental import pallas as pl
from jax.experimental.pallas import tpu as pltpu


def _cdiv(a, b):
    return -(-a // b)


def _round_up(x, m):
    return ((x + m - 1) // m) * m


def _player_mlp_kernel(x_ref, w1_ref, b1_ref, w2_ref, b2_ref, w3_ref, b3_ref,
                       o_ref):
    """Fused 3-layer MLP on one batch tile: relu(x@W1+b1) -> relu(@W2+b2) -> @W3+b3.

    Matmul inputs are in the weights' dtype (f32 or bf16); accumulation and the
    bias/ReLU epilogue are always f32 (MXU result path is f32).
    """
    cdt = w1_ref.dtype
    x = x_ref[...].astype(cdt)
    h = jnp.dot(x, w1_ref[...], preferred_element_type=jnp.float32)
    h = jnp.maximum(h + b1_ref[...], 0.0).astype(cdt)
    h = jnp.dot(h, w2_ref[...], preferred_element_type=jnp.float32)
    h = jnp.maximum(h + b2_ref[...], 0.0).astype(cdt)
    out = jnp.dot(h, w3_ref[...], preferred_element_type=jnp.float32)
    o_ref[...] = (out + b3_ref[...]).astype(o_ref.dtype)


def _choose_batch_tiling(batch, batch_tile):
    """Pick (tile_rows, num_tiles): tile rows are a multiple of 8 sublanes,
    padding is minimized, and we use >=2 tiles when feasible so v7x's two
    TensorCores both get work."""
    if batch <= 8:
        return batch, 1
    n_tiles = max(_cdiv(batch, batch_tile), 2 if batch >= 16 else 1)
    tb = _round_up(_cdiv(batch, n_tiles), 8)
    return tb, _cdiv(batch, tb)


@functools.partial(jax.jit, static_argnames=("batch_tile", "out_dtype"))
def player_forward(x, params, *, batch_tile=2048, out_dtype=None):
    """x: (B, size); params: dict of w1,b1,w2,b2,w3,b3 with weights (in,out),
    biases (1,out) (see init_player_params / prepare_player_params).

    Returns (B, size) in out_dtype (default: x.dtype), matching Player.forward.
    """
    w1, b1, w2, b2, w3, b3 = (params["w1"], params["b1"], params["w2"],
                              params["b2"], params["w3"], params["b3"])
    B, size = x.shape
    H = w1.shape[1]
    odt = x.dtype if out_dtype is None else out_dtype

    TB, grid_b = _choose_batch_tiling(B, batch_tile)

    flops = 2 * B * (size * H + H * H + H * size)
    bytes_accessed = (
        x.size * x.dtype.itemsize
        + sum(a.size * a.dtype.itemsize for a in (w1, b1, w2, b2, w3, b3))
        + B * size * jnp.dtype(odt).itemsize)

    return pl.pallas_call(
        _player_mlp_kernel,
        out_shape=jax.ShapeDtypeStruct((B, size), odt),
        grid=(grid_b,),
        in_specs=[
            pl.BlockSpec((TB, size), lambda i: (i, 0)),   # x tile (streamed)
            pl.BlockSpec((size, H), lambda i: (0, 0)),    # W1 (VMEM-resident)
            pl.BlockSpec((1, H), lambda i: (0, 0)),       # b1
            pl.BlockSpec((H, H), lambda i: (0, 0)),       # W2 (VMEM-resident)
            pl.BlockSpec((1, H), lambda i: (0, 0)),       # b2
            pl.BlockSpec((H, size), lambda i: (0, 0)),    # W3 (VMEM-resident)
            pl.BlockSpec((1, size), lambda i: (0, 0)),    # b3
        ],
        out_specs=pl.BlockSpec((TB, size), lambda i: (i, 0)),
        compiler_params=pltpu.CompilerParams(
            dimension_semantics=("parallel",)),
        cost_estimate=pl.CostEstimate(
            flops=flops, transcendentals=0, bytes_accessed=bytes_accessed),
    )(x, w1, b1, w2, b2, w3, b3)


def init_player_params(key, num_states, hidden_size):
    """Deterministic synthetic params matching nn.Linear shapes.

    PyTorch nn.Linear(in, out) has weight (out, in), bias (out); we store the
    weight transposed as (in, out) and bias as (1, out). Init mimics PyTorch's
    U(-1/sqrt(in), 1/sqrt(in)). This runs ONCE (hoisted out of the call path).
    """
    num_first_pairs = comb(num_states, 2)
    num_second_pairs = comb(num_first_pairs, 2)
    size = 2 * num_second_pairs + 3 * num_first_pairs + num_states

    dims = [(size, hidden_size), (hidden_size, hidden_size), (hidden_size, size)]
    params = {}
    for i, (fan_in, fan_out) in enumerate(dims, start=1):
        key, kw, kb = jax.random.split(key, 3)
        bound = 1.0 / (fan_in ** 0.5)
        params[f"w{i}"] = jax.random.uniform(
            kw, (fan_in, fan_out), jnp.float32, minval=-bound, maxval=bound)
        params[f"b{i}"] = jax.random.uniform(
            kb, (1, fan_out), jnp.float32, minval=-bound, maxval=bound)
    return params, size


def prepare_player_params(params, weight_dtype=jnp.bfloat16):
    """One-time prep of the fast-path params: cast weights to the MXU compute
    dtype (bf16 halves resident weight bytes); biases stay f32 because the
    bias/ReLU epilogue is computed in f32."""
    prepped = {}
    for i in (1, 2, 3):
        prepped[f"w{i}"] = params[f"w{i}"].astype(weight_dtype)
        prepped[f"b{i}"] = params[f"b{i}"].astype(jnp.float32)
    return prepped


def player_forward_ref(x, p):
    h1 = jnp.maximum(x @ p["w1"] + p["b1"], 0.0)
    h2 = jnp.maximum(h1 @ p["w2"] + p["b2"], 0.0)
    return h2 @ p["w3"] + p["b3"]


if __name__ == "__main__":
    num_states = 4        # -> C(4,2)=6 first pairs, C(6,2)=15 second pairs
    hidden_size = 32      # small hidden size for the synthetic test
    batch = 2

    key = jax.random.PRNGKey(0)
    key, kx, kx2 = jax.random.split(key, 3)
    params, size = init_player_params(key, num_states, hidden_size)
    # size = 2*15 + 3*6 + 4 = 52
    x = jax.random.normal(kx, (batch, size), jnp.float32)

    # --- small-batch exact f32 path (matches the PyTorch module) ---
    out = jax.block_until_ready(player_forward(x, params))
    ref = player_forward_ref(x, params)
    assert out.shape == (batch, size), out.shape
    assert out.dtype == jnp.float32
    assert jnp.allclose(out, ref, atol=1e-5, rtol=1e-5), "f32 mismatch vs reference"

    # --- larger batch: >=2 grid steps (both TCs on v7x), trailing partial tile ---
    big_batch = 300
    xb = jax.random.normal(kx2, (big_batch, size), jnp.float32)
    out_b = jax.block_until_ready(player_forward(xb, params))
    ref_b = player_forward_ref(xb, params)
    assert out_b.shape == (big_batch, size), out_b.shape
    assert jnp.allclose(out_b, ref_b, atol=1e-5, rtol=1e-5), "tiled f32 mismatch"

    # --- bf16 fast path: bf16 weights prepared once, bf16 activations streamed,
    #     bf16 output; f32 accumulation inside the kernel ---
    params_bf16 = prepare_player_params(params, jnp.bfloat16)
    xb_bf16 = xb.astype(jnp.bfloat16)
    out_bf = jax.block_until_ready(player_forward(xb_bf16, params_bf16))
    assert out_bf.shape == (big_batch, size)
    assert out_bf.dtype == jnp.bfloat16
    assert jnp.allclose(out_bf.astype(jnp.float32), ref_b,
                        atol=5e-2, rtol=5e-2), "bf16 mismatch"

    print("KERNEL_OK")
</pallas_src>

<mosaic_0001>
module attributes {stable_mosaic.version = 11 : i64} {
  func.func @_player_mlp_kernel(%arg0: i32, %arg1: memref<2x52xf32, #tpu.memory_space<vmem>>, %arg2: memref<52x32xf32, #tpu.memory_space<vmem>>, %arg3: memref<1x32xf32, #tpu.memory_space<vmem>>, %arg4: memref<32x32xf32, #tpu.memory_space<vmem>>, %arg5: memref<1x32xf32, #tpu.memory_space<vmem>>, %arg6: memref<32x52xf32, #tpu.memory_space<vmem>>, %arg7: memref<1x52xf32, #tpu.memory_space<vmem>>, %arg8: memref<2x52xf32, #tpu.memory_space<vmem>>) attributes {dimension_semantics = [#tpu.dimension_semantics<parallel>], iteration_bounds = array<i64: 1>, scalar_prefetch = 0 : i64, scratch_operands = 0 : i64, tpu.core_type = #tpu.core_type<tc>, window_params = [{transform_indices = @transform_0, window_bounds = array<i64: 2, 52>}, {pipeline_mode = #tpu.pipeline_mode<synchronous>, transform_indices = @transform_1, window_bounds = array<i64: 52, 32>}, {pipeline_mode = #tpu.pipeline_mode<synchronous>, transform_indices = @transform_2, window_bounds = array<i64: 1, 32>}, {pipeline_mode = #tpu.pipeline_mode<synchronous>, transform_indices = @transform_3, window_bounds = array<i64: 32, 32>}, {pipeline_mode = #tpu.pipeline_mode<synchronous>, transform_indices = @transform_4, window_bounds = array<i64: 1, 32>}, {pipeline_mode = #tpu.pipeline_mode<synchronous>, transform_indices = @transform_5, window_bounds = array<i64: 32, 52>}, {pipeline_mode = #tpu.pipeline_mode<synchronous>, transform_indices = @transform_6, window_bounds = array<i64: 1, 52>}, {transform_indices = @transform_7, window_bounds = array<i64: 2, 52>}]} {
    %c0 = arith.constant 0 : index
    %c0_0 = arith.constant 0 : index
    %0 = vector.load %arg1[%c0, %c0_0] : memref<2x52xf32, #tpu.memory_space<vmem>>, vector<2x52xf32>
    %c0_1 = arith.constant 0 : index
    %c0_2 = arith.constant 0 : index
    %1 = vector.load %arg2[%c0_1, %c0_2] : memref<52x32xf32, #tpu.memory_space<vmem>>, vector<52x32xf32>
    %cst = arith.constant dense<0.000000e+00> : vector<2x32xf32>
    %2 = tpu.matmul %0, %1, %cst {dimension_numbers = #tpu.dot_dimension_numbers<[1], [0], [0], [1], [0, 0, 1, 1], [], []>} : vector<2x52xf32>, vector<52x32xf32>, vector<2x32xf32> -> vector<2x32xf32>
    %c0_3 = arith.constant 0 : index
    %c0_4 = arith.constant 0 : index
    %3 = vector.load %arg3[%c0_3, %c0_4] : memref<1x32xf32, #tpu.memory_space<vmem>>, vector<1x32xf32>
    %4 = vector.broadcast %3 : vector<1x32xf32> to vector<2x32xf32>
    %5 = arith.addf %2, %4 : vector<2x32xf32>
    %cst_5 = arith.constant 0.000000e+00 : f32
    %6 = vector.broadcast %cst_5 : f32 to vector<2x32xf32>
    %7 = arith.maximumf %5, %6 : vector<2x32xf32>
    %c0_6 = arith.constant 0 : index
    %c0_7 = arith.constant 0 : index
    %8 = vector.load %arg4[%c0_6, %c0_7] : memref<32x32xf32, #tpu.memory_space<vmem>>, vector<32x32xf32>
    %cst_8 = arith.constant dense<0.000000e+00> : vector<2x32xf32>
    %9 = tpu.matmul %7, %8, %cst_8 {dimension_numbers = #tpu.dot_dimension_numbers<[1], [0], [0], [1], [0, 0, 1, 1], [], []>} : vector<2x32xf32>, vector<32x32xf32>, vector<2x32xf32> -> vector<2x32xf32>
    %c0_9 = arith.constant 0 : index
    %c0_10 = arith.constant 0 : index
    %10 = vector.load %arg5[%c0_9, %c0_10] : memref<1x32xf32, #tpu.memory_space<vmem>>, vector<1x32xf32>
    %11 = vector.broadcast %10 : vector<1x32xf32> to vector<2x32xf32>
    %12 = arith.addf %9, %11 : vector<2x32xf32>
    %cst_11 = arith.constant 0.000000e+00 : f32
    %13 = vector.broadcast %cst_11 : f32 to vector<2x32xf32>
    %14 = arith.maximumf %12, %13 : vector<2x32xf32>
    %c0_12 = arith.constant 0 : index
    %c0_13 = arith.constant 0 : index
    %15 = vector.load %arg6[%c0_12, %c0_13] : memref<32x52xf32, #tpu.memory_space<vmem>>, vector<32x52xf32>
    %cst_14 = arith.constant dense<0.000000e+00> : vector<2x52xf32>
    %16 = tpu.matmul %14, %15, %cst_14 {dimension_numbers = #tpu.dot_dimension_numbers<[1], [0], [0], [1], [0, 0, 1, 1], [], []>} : vector<2x32xf32>, vector<32x52xf32>, vector<2x52xf32> -> vector<2x52xf32>
    %c0_15 = arith.constant 0 : index
    %c0_16 = arith.constant 0 : index
    %17 = vector.load %arg7[%c0_15, %c0_16] : memref<1x52xf32, #tpu.memory_space<vmem>>, vector<1x52xf32>
    %18 = vector.broadcast %17 : vector<1x52xf32> to vector<2x52xf32>
    %19 = arith.addf %16, %18 : vector<2x52xf32>
    %c0_17 = arith.constant 0 : index
    %c0_18 = arith.constant 0 : index
    %20 = vector.load %arg8[%c0_17, %c0_18] : memref<2x52xf32, #tpu.memory_space<vmem>>, vector<2x52xf32>
    tpu.vector_store %arg8[%c0_17, %c0_18], %19 {strides = array<i32>} : memref<2x52xf32, #tpu.memory_space<vmem>>, vector<2x52xf32>,
    return
  }
  func.func @transform_0(%arg0: i32) -> (i32, i32) {
    %c0_i32 = arith.constant 0 : i32
    %c0_i32_0 = arith.constant 0 : i32
    return %arg0, %c0_i32 : i32, i32
  }
  func.func @transform_1(%arg0: i32) -> (i32, i32) {
    %c0_i32 = arith.constant 0 : i32
    %c0_i32_0 = arith.constant 0 : i32
    %c0_i32_1 = arith.constant 0 : i32
    return %c0_i32, %c0_i32_0 : i32, i32
  }
  func.func @transform_2(%arg0: i32) -> (i32, i32) {
    %c0_i32 = arith.constant 0 : i32
    %c0_i32_0 = arith.constant 0 : i32
    %c0_i32_1 = arith.constant 0 : i32
    return %c0_i32, %c0_i32_0 : i32, i32
  }
  func.func @transform_3(%arg0: i32) -> (i32, i32) {
    %c0_i32 = arith.constant 0 : i32
    %c0_i32_0 = arith.constant 0 : i32
    %c0_i32_1 = arith.constant 0 : i32
    return %c0_i32, %c0_i32_0 : i32, i32
  }
  func.func @transform_4(%arg0: i32) -> (i32, i32) {
    %c0_i32 = arith.constant 0 : i32
    %c0_i32_0 = arith.constant 0 : i32
    %c0_i32_1 = arith.constant 0 : i32
    return %c0_i32, %c0_i32_0 : i32, i32
  }
  func.func @transform_5(%arg0: i32) -> (i32, i32) {
    %c0_i32 = arith.constant 0 : i32
    %c0_i32_0 = arith.constant 0 : i32
    %c0_i32_1 = arith.constant 0 : i32
    return %c0_i32, %c0_i32_0 : i32, i32
  }
  func.func @transform_6(%arg0: i32) -> (i32, i32) {
    %c0_i32 = arith.constant 0 : i32
    %c0_i32_0 = arith.constant 0 : i32
    %c0_i32_1 = arith.constant 0 : i32
    return %c0_i32, %c0_i32_0 : i32, i32
  }
  func.func @transform_7(%arg0: i32) -> (i32, i32) {
    %c0_i32 = arith.constant 0 : i32
    %c0_i32_0 = arith.constant 0 : i32
    return %arg0, %c0_i32 : i32, i32
  }
}

</mosaic_0001>

<bundles_post_ra>
// kernel: player_forward.1
= control target key start
LH: loop header
LB: loop body
LE: loop exit
PB: predicated region body
PF: predicated region fallthrough
CT: control target
= control target key end

     0   :  { %v420_v3 = vmov 0.0|0.0   ;;  %vm421_vm0 = vmmov 0   ;;  %v422_v6 = vmov 0.0   ;;  %s538_s0 = inlined_call_operand.vmem [shape: f32[2,52], index: 0, kind: input, shape index: {}]   ;;  %s539_s1 = inlined_call_operand.vmem [shape: f32[52,32], index: 1, kind: input, shape index: {}]   ;;  %s540_s2 = inlined_call_operand.vmem [shape: f32[1,32], index: 2, kind: input, shape index: {}]   ;;  %s541_s3 = inlined_call_operand.vmem [shape: f32[32,32], index: 3, kind: input, shape index: {}]   ;;  %s542_s4 = inlined_call_operand.vmem [shape: f32[1,32], index: 4, kind: input, shape index: {}]   ;;  %s543_s5 = inlined_call_operand.vmem [shape: f32[32,52], index: 5, kind: input, shape index: {}]   ;;  %s544_s6 = inlined_call_operand.vmem [shape: f32[1,52], index: 6, kind: input, shape index: {}]   ;;  %s545_s7 = inlined_call_operand.hbm [shape: f32[2,52], index: 7, kind: output, shape index: {}]  }
   0x1   :  { %v28_v0 = vld [vmem:[%s539_s1] sm:$0xff]  ;;  %v29_v1 = vld [vmem:[%s539_s1 + $0x8] sm:$0xff]  ;;  %v30_v2 = vld [vmem:[%s539_s1 + $0x10] sm:$0xff]  ;;  %371 = vmatprep.subr.bf16.mxu0 %v420_v3  ;;  %380 = vmatprep.subr.bf16.mxu1 %v420_v3 }
   0x2   :  { %v372_v4 = vpack.c.bf16 %v29_v1, %v28_v0  ;;  %v31_v5 = vld [vmem:[%s539_s1 + $0x18] sm:$0xff]  ;;  %346 = vmatprep.mubr.msk.f32.mxu0 %vm421_vm0, %v422_v6  ;;  %v121_v7 = vld [vmem:[%s541_s3] sm:$0xff]  ;;  %357 = vmatprep.mubr.msk.f32.mxu1 %vm421_vm0, %v422_v6  ;;  %v122_v9 = vld [vmem:[%s541_s3 + $0x8] sm:$0xff] }
   0x3   :  { %v375_v8 = vpack.c.bf16 %v31_v5, %v30_v2 }
   0x4   :  { %373 = vmatpush3.bf16.msra.mxu0 %v372_v4 }
   0x5   :  { %12 = vsyncpa [#allocation3], 0  ;;  %374 = vmatprep.subr.bf16.mxu0 %v420_v3  ;;  %v32_v10 = vld [vmem:[%s539_s1 + $0x20] sm:$0xff]  ;;  %v33_v11 = vld [vmem:[%s539_s1 + $0x28] sm:$0xff]  ;;  %v381_v12 = vpack.c.bf16 %v122_v9, %v121_v7  ;;  %vm46_vm1 = vcmask 1043456   ;;  %vm42_vm2 = vcmask 424960  }
   0x6   :  { %v378_v13 = vpack.c.bf16 %v33_v11, %v32_v10  ;;  %v34_v14 = vld [vmem:[%s539_s1 + $0x30] sm:$0xf]  ;;  %v27_v15 = vld [vmem:[%s538_s0] sm:$0x3]  ;;  %v124_v17 = vld [vmem:[%s541_s3 + $0x18] sm:$0xff]  ;;  %vm132_vm3 = vcmask 261120  }
   0x7   :  { %382 = vmatpush3.bf16.msra.mxu1 %v381_v12  ;;  %v123_v16 = vld [vmem:[%s541_s3 + $0x10] sm:$0xff]  ;;  %v307_v19 = vld [vmem:[%s540_s2] ss:$0 sm:$0xff]  ;;  %v208_v21 = vld [vmem:[%s543_s5 + $0x8] sm:$0xff]  ;;  %s423_s12 = smov [#allocation2]   ;;  %vm291_vm4 = vcmask 418816  }
   0x8   :  { %376 = vmatpush3.bf16.msra.mxu0 %v375_v8  ;;  %383 = vmatprep.subr.bf16.mxu1 %v420_v3  ;;  %v384_v18 = vpack.c.bf16 %v124_v17, %v123_v16  ;;  %v207_v20 = vld [vmem:[%s543_s5] sm:$0xff]  ;;  %v209_v27 = vld [vmem:[%s543_s5 + $0x10] sm:$0xff]  ;;  %v210_v28 = vld [vmem:[%s543_s5 + $0x18] sm:$0xff]  ;;  %s299_s13 = sshll.u32 %s423_s12, 4  ;;  %s300_s13 = int_to_ptr.vmem [resolvable:$true] %s299_s13 }
   0x9   :  { %377 = vmatprep.subr.bf16.mxu0 %v420_v3  ;;  %v387_v25 = vpack.c.bf16 %v208_v21, %v207_v20  ;;  %v390_v29 = vpack.c.bf16 %v210_v28, %v209_v27  ;;  %v310_v30 = vld [vmem:[%s542_s4] ss:$0 sm:$0xff]  ;;  %s396_s5 = scalar_lea.vmem %s300_s13, 32  ;;  %p401_p1 = scmp.lt.s32.totalorder %s300_s13, %s300_s13 }
   0xa   :  { %v312_v35 = vld [vmem:[%s544_s6] ss:$0 sm:$0xff]  ;;  %p397_p0 = scmp.ne.s32.totalorder %s300_s13, %s396_s5  ;;  %p402_p2 = scmp.lt.s32.totalorder %s396_s5, %s396_s5 }
   0xb   :  { %385 = vmatpush3.bf16.msra.mxu1 %v384_v18 }
   0xc   :  { %379 = vmatpush3.bf16.msra.mxu0 %v378_v13  ;;  %386 = vmatprep.subr.bf16.mxu1 %v420_v3  ;;  %p403_p3 = por %p402_p2, %p401_p1 }
   0xd   :  { %344 = vmatprep.subr.mxu0 %v422_v6 }
   0xe   :  { %p404_p4 = pnand %p403_p3, %p397_p0 }
  0x10   :  { %345 = vmatpush3.msk.msra.mxu0 %vm46_vm1, %v34_v14 }
  0x11   :  { %347 = vmatmul.mubr.msk.f32.vlgmr.msra.gmra.mrb[0].mxu0 %vm42_vm2, %v27_v15 }
  0xe4   :  { %v116_v22 = vpop.f32.mrb[0].mxu0 }
  0xe5   :  { %v117_v23 = vadd.f32 %v307_v19, %v116_v22  ;;  %v348_v24 = vpop.f32.mrb[1].mxu0 }
  0xe7   :  { %v120_v26 = vmax.f32 %v117_v23, 0.0 }
  0xe9   :  { %358 = vmatmul.mubr.msk.f32.vlgmr.msra.gmra.mrb[0].mxu1 %vm132_vm3, %v120_v26 }
  0xea   :  { %388 = vmatpush3.bf16.msra.mxu1 %v387_v25  ;;  %368 = vmatprep.mubr.msk.f32.mxu1 %vm421_vm0, %v422_v6 }
  0xeb   :  { %389 = vmatprep.subr.bf16.mxu1 %v420_v3 }
  0xee   :  { %391 = vmatpush3.bf16.msra.mxu1 %v390_v29 }
 0x1bc   :  { %v202_v31 = vpop.f32.mrb[0].mxu1 }
 0x1bd   :  { %v203_v32 = vadd.f32 %v310_v30, %v202_v31  ;;  %v359_v33 = vpop.f32.mrb[1].mxu1 }
 0x1bf   :  { %v206_v34 = vmax.f32 %v203_v32, 0.0 }
 0x1c1   :  { %369 = vmatmul.mubr.msk.f32.vlgmr.msra.gmra.mrb[2].mxu1 %vm132_vm3, %v206_v34 }
 0x294   :  { %v287_v36 = vpop.f32.mrb[2].mxu1 }
 0x295   :  { %v288_v37 = vadd.f32 %v312_v35, %v287_v36  ;;  %v370_v38 = vpop.f32.mrb[3].mxu1 }
 0x297   :  { %292 = vst.msk [vmem:[#allocation2] sm:$0x3] %vm291_vm4, %v288_v37 }
 0x298   :  { %407 = shalt.err (!%p404_p4)
}
 0x299   :  { %s408_s15 = scalar_lea.hbm %s545_s7, 32 }
 0x29a   :  { %p409_p5 = scmp.ne.s32.totalorder %s545_s7, %s408_s15  ;;  %p412_p6 = scmp.lt.u32.totalorder %s408_s15, %s545_s7 }
 0x29c   :  { %p414_p7 = pnand %p412_p6, %p409_p5 }
 0x29e   :  { %417 = shalt.err (!%p414_p7)
}
 0x29f   :  { %302 = dma.vmem_to_hbm [thread:$0]  %s300_s13, 32, %s545_s7, [#allocation3]  }
 0x2a0   :  { %418 = dma.done.wait [#allocation3], 32  }
 0x2a1   :  { %419 = vsyncadd [#allocation3], 4294967264 }
 0x2a2   :  { %306 = vsyncpa [#allocation3], 1 }

</bundles_post_ra>
